<compile_context>
chip_gen: v7x
topology: tpu7x:2x2x1
jax: 0.10.0
libtpu: 0.0.40
codegen_flags: <defaults>
</compile_context>

<pallas_src>
import jax
import jax.numpy as jnp
from jax import lax
from jax.experimental import pallas as pl
from jax.experimental.pallas import tpu as pltpu


# ----------------------------------------------------------------------------
# Kernel bodies
# ----------------------------------------------------------------------------

def _swiglu_block(x, w1, w3, w2t):
    """One (tm, th) SwiGLU block; returns the f32 partial down-projection."""
    # Up-projections: x is (tm, dim); w1/w3 stay in torch (out, in) layout and
    # are contracted on their "in" axis (trans_b form, native MXU feed).
    dn_t = (((1,), (1,)), ((), ()))
    h1 = lax.dot_general(x, w1, dn_t, preferred_element_type=jnp.float32)   # (tm, th)
    h3 = lax.dot_general(x, w3, dn_t, preferred_element_type=jnp.float32)   # (tm, th)
    # silu(h1) * h3, cast back to the MXU operand dtype (bf16 in real runs).
    g = (h1 * jax.nn.sigmoid(h1) * h3).astype(x.dtype)                      # (tm, th)
    # Down-projection with the pre-transposed w2 slab (th, dim): native (M,K)x(K,N).
    dn_n = (((1,), (0,)), ((), ()))
    return lax.dot_general(g, w2t, dn_n, preferred_element_type=jnp.float32)  # (tm, dim)


def _swiglu_kernel_acc(x_ref, w1_ref, w3_ref, w2t_ref, o_ref, acc_ref):
    """Multi hidden-tile path: accumulate partial down-projections in f32 VMEM."""
    j = pl.program_id(1)

    @pl.when(j == 0)
    def _():
        acc_ref[...] = jnp.zeros_like(acc_ref)

    acc_ref[...] += _swiglu_block(x_ref[...], w1_ref[...], w3_ref[...], w2t_ref[...])

    @pl.when(j == pl.num_programs(1) - 1)
    def _():
        o_ref[...] = acc_ref[...].astype(o_ref.dtype)


def _swiglu_kernel_direct(x_ref, w1_ref, w3_ref, w2t_ref, o_ref):
    """Single hidden-tile path: skip the (tm, dim) f32 accumulator round trip."""
    o_ref[...] = _swiglu_block(
        x_ref[...], w1_ref[...], w3_ref[...], w2t_ref[...]).astype(o_ref.dtype)


# ----------------------------------------------------------------------------
# Tile selection helpers
# ----------------------------------------------------------------------------

def _pick_tile(total: int, target: int, quantum: int) -> int:
    """Largest multiple of `quantum` dividing `total` that is <= target.
    If total <= target, the full extent is always a legal block."""
    if total <= target:
        return total
    t = (target // quantum) * quantum
    while t >= quantum:
        if total % t == 0:
            return t
        t -= quantum
    return total


def _pick_m_tile(M: int, target: int, quantum: int) -> int:
    """Like _pick_tile, but prefer MXU-height multiples (256, 128) so every
    MXU pass is full."""
    for q in (256, 128):
        if q < quantum or q > target:
            continue
        t = _pick_tile(M, target, q)
        if t <= target and t % q == 0:
            return t
    return _pick_tile(M, target, quantum)


def _hw_budget():
    """Return (vmem_capacity_bytes, is_v7x_like) with conservative fallbacks."""
    vmem = None
    try:
        info = pltpu.get_tpu_info()
        vmem = getattr(info, "vmem_capacity_bytes", None)
    except Exception:
        vmem = None
    kind = ""
    try:
        kind = jax.devices()[0].device_kind.lower()
    except Exception:
        pass
    is_v7 = ("v7" in kind) or ("7x" in kind)
    if vmem is None:
        vmem = (64 if is_v7 else 128) * 2**20
    is_v7 = is_v7 or vmem <= 64 * 2**20
    return int(vmem), is_v7


def _vmem_estimate(tm, th, dim, x_it, w_it):
    """Rough, conservative per-step VMEM footprint (double-buffered tiles)."""
    return (2 * tm * dim * x_it          # x tile
            + 2 * 2 * th * dim * w_it    # w1, w3 slabs
            + 2 * th * dim * w_it        # w2^T slab
            + 2 * tm * dim * x_it        # output tile
            + tm * dim * 4               # f32 accumulator scratch
            + 3 * tm * th * 4)           # h1, h3, g f32 intermediates


# ----------------------------------------------------------------------------
# Public wrapper
# ----------------------------------------------------------------------------

def swiglu(x, w1, w2, w3, *, tm=None, th=None, compute_in_bf16=False):
    """SwiGLU forward.

    x:  (batch, seq, dim)
    w1: (hidden, dim)   torch Linear (out, in) layout
    w2: (dim, hidden)   torch Linear (out, in) layout
    w3: (hidden, dim)   torch Linear (out, in) layout
    compute_in_bf16: cast f32 operands to bf16 for the matmuls (accumulation
    stays f32 in-kernel); recovers full MXU rate and halves weight DMA.
    """
    batch, seq, dim = x.shape
    hidden, dim_w = w1.shape
    assert dim_w == dim
    assert w3.shape == (hidden, dim)
    assert w2.shape == (dim, hidden)

    out_dtype = x.dtype
    if compute_in_bf16 and x.dtype == jnp.float32:
        x = x.astype(jnp.bfloat16)
        w1 = w1.astype(jnp.bfloat16)
        w2 = w2.astype(jnp.bfloat16)
        w3 = w3.astype(jnp.bfloat16)

    M = batch * seq
    x_it = jnp.dtype(x.dtype).itemsize
    w_it = jnp.dtype(w1.dtype).itemsize
    # Sub-32-bit dtypes pack along sublanes: min second-minor quantum is 32/itemsize.
    tm_quantum = max(8, 32 // x_it)

    vmem_cap, is_v7x = _hw_budget()
    if is_v7x:
        tm_target, th_target = 512, 256          # 64 MiB VMEM, ~310 flops/byte roofline
        vmem_hard_cap = 56 * 2**20
    else:
        tm_target, th_target = 1024, 512         # v5e/v6e: 128 MiB VMEM
        vmem_hard_cap = 100 * 2**20
    vmem_hard_cap = min(vmem_hard_cap, int(0.85 * vmem_cap))
    fit_budget = int(0.8 * vmem_hard_cap)

    if tm is None:
        tm = _pick_m_tile(M, tm_target, tm_quantum)
    if th is None:
        th = _pick_tile(hidden, th_target, 128)

    # Shrink tiles until the estimated VMEM footprint fits the budget.
    while _vmem_estimate(tm, th, dim, x_it, w_it) > fit_budget:
        if th > 128:
            new_th = _pick_tile(hidden, th // 2, 128)
            if new_th < th:
                th = new_th
                continue
        if tm > tm_quantum:
            new_tm = _pick_tile(M, tm // 2, tm_quantum)
            if new_tm < tm:
                tm = new_tm
                continue
        break

    # v7x has two TensorCores and M is the only "parallel" grid axis: make sure
    # there are at least two M tiles when the shape allows it.
    if is_v7x and tm == M and M >= 2 * tm_quantum:
        half = _pick_tile(M, M // 2, tm_quantum)
        if half < M:
            tm = half

    # TODO(synk): add a padding/masking path for ragged M or non-divisible hidden.
    assert M % tm == 0, "token count must be divisible by tm"
    assert hidden % th == 0, "hidden dim must be divisible by th"

    x2d = x.reshape(M, dim)
    # Pre-transpose w2 once so its per-step block is a contiguous (th, dim) row
    # slab (single DMA descriptor) and the down-projection is a native MXU feed.
    # In a real model, store w2 pre-transposed at weight-load time instead.
    w2t = jnp.transpose(w2)                      # (hidden, dim)

    grid = (M // tm, hidden // th)
    multi_step = grid[1] > 1

    vmem_est = _vmem_estimate(tm, th, dim, x_it, w_it)
    vmem_limit = int(min(vmem_hard_cap, max(32 * 2**20, int(1.25 * vmem_est))))

    cost = pl.CostEstimate(
        flops=6 * M * dim * hidden,              # three matmuls, 2*M*dim*hidden each
        transcendentals=M * hidden,              # sigmoid
        bytes_accessed=int(2 * M * dim * x_it            # x read + out write
                           + grid[0] * 3 * hidden * dim * w_it),  # weights re-streamed per M tile
    )

    kernel = _swiglu_kernel_acc if multi_step else _swiglu_kernel_direct
    scratch = [pltpu.VMEM((tm, dim), jnp.float32)] if multi_step else []

    out2d = pl.pallas_call(
        kernel,
        out_shape=jax.ShapeDtypeStruct((M, dim), out_dtype),
        grid_spec=pltpu.PrefetchScalarGridSpec(
            num_scalar_prefetch=0,
            grid=grid,                                              # (M tiles, hidden tiles)
            in_specs=[
                pl.BlockSpec((tm, dim), lambda i, j: (i, 0)),       # x tile (resident over j)
                pl.BlockSpec((th, dim), lambda i, j: (j, 0)),       # w1 hidden row-slab
                pl.BlockSpec((th, dim), lambda i, j: (j, 0)),       # w3 hidden row-slab
                pl.BlockSpec((th, dim), lambda i, j: (j, 0)),       # w2^T hidden row-slab (contiguous)
            ],
            out_specs=pl.BlockSpec((tm, dim), lambda i, j: (i, 0)), # output resident over j
            scratch_shapes=scratch,
        ),
        compiler_params=pltpu.CompilerParams(
            dimension_semantics=("parallel", "arbitrary"),
            vmem_limit_bytes=vmem_limit,
        ),
        cost_estimate=cost,
    )(x2d, w1, w3, w2t)

    return out2d.reshape(batch, seq, dim)


def swiglu_ref(x, w1, w2, w3):
    h1 = x @ w1.T
    h3 = x @ w3.T
    return (jax.nn.silu(h1) * h3) @ w2.T


if __name__ == "__main__":
    # Small shapes consistent with the module: dim=128, hidden_dim=256,
    # batch=2, seq=8. (multiple_of / ffn_dim_multiplier are unused by the
    # reference forward, since __init__ takes hidden_dim directly.)
    batch, seq, dim, hidden = 2, 8, 128, 256

    key = jax.random.PRNGKey(0)
    kx, k1, k2, k3 = jax.random.split(key, 4)
    x = jax.random.normal(kx, (batch, seq, dim), dtype=jnp.float32)
    # Deterministic "Linear(bias=False)" weights in torch layout (out, in).
    w1 = jax.random.normal(k1, (hidden, dim), dtype=jnp.float32) * 0.02
    w2 = jax.random.normal(k2, (dim, hidden), dtype=jnp.float32) * 0.02
    w3 = jax.random.normal(k3, (hidden, dim), dtype=jnp.float32) * 0.02

    ref = swiglu_ref(x, w1, w2, w3)

    # Small explicit tiles: exercises the multi-step grid (2 M-tiles x
    # 2 hidden-tiles) and the f32 accumulator init/finalize path.
    out = swiglu(x, w1, w2, w3, tm=8, th=128)
    jax.block_until_ready(out)
    assert out.shape == (batch, seq, dim)
    assert jnp.allclose(out, ref, atol=1e-4, rtol=1e-4), \
        float(jnp.max(jnp.abs(out - ref)))

    # Default (generation-aware, large-tile) settings: single hidden tile here,
    # exercising the direct-write (no accumulator) path.
    out2 = swiglu(x, w1, w2, w3)
    jax.block_until_ready(out2)
    assert jnp.allclose(out2, ref, atol=1e-4, rtol=1e-4), \
        float(jnp.max(jnp.abs(out2 - ref)))

    print("KERNEL_OK")
</pallas_src>

<mosaic_0001>
module attributes {stable_mosaic.version = 11 : i64} {
  func.func @_swiglu_kernel_acc(%arg0: i32, %arg1: i32, %arg2: memref<8x128xf32, #tpu.memory_space<vmem>>, %arg3: memref<128x128xf32, #tpu.memory_space<vmem>>, %arg4: memref<128x128xf32, #tpu.memory_space<vmem>>, %arg5: memref<128x128xf32, #tpu.memory_space<vmem>>, %arg6: memref<8x128xf32, #tpu.memory_space<vmem>>, %arg7: memref<8x128xf32, #tpu.memory_space<vmem>>) attributes {dimension_semantics = [#tpu.dimension_semantics<parallel>, #tpu.dimension_semantics<arbitrary>], iteration_bounds = array<i64: 2, 2>, scalar_prefetch = 0 : i64, scratch_operands = 1 : i64, tpu.core_type = #tpu.core_type<tc>, window_params = [{transform_indices = @transform_0, window_bounds = array<i64: 8, 128>}, {transform_indices = @transform_1, window_bounds = array<i64: 128, 128>}, {transform_indices = @transform_2, window_bounds = array<i64: 128, 128>}, {transform_indices = @transform_3, window_bounds = array<i64: 128, 128>}, {transform_indices = @transform_4, window_bounds = array<i64: 8, 128>}]} {
    %c0_i32 = arith.constant 0 : i32
    %0 = arith.cmpi eq, %arg1, %c0_i32 : i32
    %1 = arith.extui %0 : i1 to i32
    %c0_i32_0 = arith.constant 0 : i32
    %2 = arith.cmpi ne, %1, %c0_i32_0 : i32
    scf.if %2 {
      %cst_16 = arith.constant 0.000000e+00 : f32
      %23 = vector.broadcast %cst_16 : f32 to vector<8x128xf32>
      %c0_17 = arith.constant 0 : index
      %c0_18 = arith.constant 0 : index
      %24 = vector.load %arg7[%c0_17, %c0_18] : memref<8x128xf32, #tpu.memory_space<vmem>>, vector<8x128xf32>
      tpu.vector_store %arg7[%c0_17, %c0_18], %23 {strides = array<i32>} : memref<8x128xf32, #tpu.memory_space<vmem>>, vector<8x128xf32>,
    } else {
    }
    %c0 = arith.constant 0 : index
    %c0_1 = arith.constant 0 : index
    %3 = vector.load %arg7[%c0, %c0_1] : memref<8x128xf32, #tpu.memory_space<vmem>>, vector<8x128xf32>
    %c0_2 = arith.constant 0 : index
    %c0_3 = arith.constant 0 : index
    %4 = vector.load %arg2[%c0_2, %c0_3] : memref<8x128xf32, #tpu.memory_space<vmem>>, vector<8x128xf32>
    %c0_4 = arith.constant 0 : index
    %c0_5 = arith.constant 0 : index
    %5 = vector.load %arg3[%c0_4, %c0_5] : memref<128x128xf32, #tpu.memory_space<vmem>>, vector<128x128xf32>
    %c0_6 = arith.constant 0 : index
    %c0_7 = arith.constant 0 : index
    %6 = vector.load %arg4[%c0_6, %c0_7] : memref<128x128xf32, #tpu.memory_space<vmem>>, vector<128x128xf32>
    %c0_8 = arith.constant 0 : index
    %c0_9 = arith.constant 0 : index
    %7 = vector.load %arg5[%c0_8, %c0_9] : memref<128x128xf32, #tpu.memory_space<vmem>>, vector<128x128xf32>
    %cst = arith.constant dense<0.000000e+00> : vector<8x128xf32>
    %8 = tpu.matmul %4, %5, %cst {dimension_numbers = #tpu.dot_dimension_numbers<[1], [1], [0], [0], [0, 0, 1, 0], [], []>} : vector<8x128xf32>, vector<128x128xf32>, vector<8x128xf32> -> vector<8x128xf32>
    %cst_10 = arith.constant dense<0.000000e+00> : vector<8x128xf32>
    %9 = tpu.matmul %4, %6, %cst_10 {dimension_numbers = #tpu.dot_dimension_numbers<[1], [1], [0], [0], [0, 0, 1, 0], [], []>} : vector<8x128xf32>, vector<128x128xf32>, vector<8x128xf32> -> vector<8x128xf32>
    %10 = arith.negf %8 : vector<8x128xf32>
    %11 = math.exp %10 : vector<8x128xf32>
    %cst_11 = arith.constant 1.000000e+00 : f32
    %12 = vector.broadcast %cst_11 : f32 to vector<8x128xf32>
    %13 = arith.addf %12, %11 : vector<8x128xf32>
    %14 = arith.divf %12, %13 : vector<8x128xf32>
    %15 = arith.mulf %8, %14 : vector<8x128xf32>
    %16 = arith.mulf %15, %9 : vector<8x128xf32>
    %cst_12 = arith.constant dense<0.000000e+00> : vector<8x128xf32>
    %17 = tpu.matmul %16, %7, %cst_12 {dimension_numbers = #tpu.dot_dimension_numbers<[1], [0], [0], [1], [0, 0, 1, 1], [], []>} : vector<8x128xf32>, vector<128x128xf32>, vector<8x128xf32> -> vector<8x128xf32>
    %18 = arith.addf %3, %17 : vector<8x128xf32>
    %c0_13 = arith.constant 0 : index
    %c0_14 = arith.constant 0 : index
    %19 = vector.load %arg7[%c0_13, %c0_14] : memref<8x128xf32, #tpu.memory_space<vmem>>, vector<8x128xf32>
    tpu.vector_store %arg7[%c0_13, %c0_14], %18 {strides = array<i32>} : memref<8x128xf32, #tpu.memory_space<vmem>>, vector<8x128xf32>,
    %c1_i32 = arith.constant 1 : i32
    %20 = arith.cmpi eq, %arg1, %c1_i32 : i32
    %21 = arith.extui %20 : i1 to i32
    %c0_i32_15 = arith.constant 0 : i32
    %22 = arith.cmpi ne, %21, %c0_i32_15 : i32
    scf.if %22 {
      %c0_16 = arith.constant 0 : index
      %c0_17 = arith.constant 0 : index
      %23 = vector.load %arg7[%c0_16, %c0_17] : memref<8x128xf32, #tpu.memory_space<vmem>>, vector<8x128xf32>
      %c0_18 = arith.constant 0 : index
      %c0_19 = arith.constant 0 : index
      %24 = vector.load %arg6[%c0_18, %c0_19] : memref<8x128xf32, #tpu.memory_space<vmem>>, vector<8x128xf32>
      tpu.vector_store %arg6[%c0_18, %c0_19], %23 {strides = array<i32>} : memref<8x128xf32, #tpu.memory_space<vmem>>, vector<8x128xf32>,
    } else {
    }
    return
  }
  func.func @transform_0(%arg0: i32, %arg1: i32) -> (i32, i32) {
    %c0_i32 = arith.constant 0 : i32
    %c0_i32_0 = arith.constant 0 : i32
    return %arg0, %c0_i32 : i32, i32
  }
  func.func @transform_1(%arg0: i32, %arg1: i32) -> (i32, i32) {
    %c0_i32 = arith.constant 0 : i32
    %c0_i32_0 = arith.constant 0 : i32
    return %arg1, %c0_i32 : i32, i32
  }
  func.func @transform_2(%arg0: i32, %arg1: i32) -> (i32, i32) {
    %c0_i32 = arith.constant 0 : i32
    %c0_i32_0 = arith.constant 0 : i32
    return %arg1, %c0_i32 : i32, i32
  }
  func.func @transform_3(%arg0: i32, %arg1: i32) -> (i32, i32) {
    %c0_i32 = arith.constant 0 : i32
    %c0_i32_0 = arith.constant 0 : i32
    return %arg1, %c0_i32 : i32, i32
  }
  func.func @transform_4(%arg0: i32, %arg1: i32) -> (i32, i32) {
    %c0_i32 = arith.constant 0 : i32
    %c0_i32_0 = arith.constant 0 : i32
    return %arg0, %c0_i32 : i32, i32
  }
}

</mosaic_0001>

<bundles_post_ra>
// kernel: tpu_custom_call.1
= control target key start
LH: loop header
LB: loop body
LE: loop exit
PB: predicated region body
PF: predicated region fallthrough
CT: control target
= control target key end

     0   :  { %s1949_s0 = inlined_call_operand.hbm [shape: f32[16,128], index: 0, kind: input, shape index: {}]   ;;  %s1950_s1 = inlined_call_operand.hbm [shape: f32[256,128], index: 1, kind: input, shape index: {}]   ;;  %s1951_s2 = inlined_call_operand.hbm [shape: f32[256,128], index: 2, kind: input, shape index: {}]   ;;  %s1952_s3 = inlined_call_operand.hbm [shape: f32[256,128], index: 3, kind: input, shape index: {}]   ;;  %s1953_s4 = inlined_call_operand.hbm [shape: f32[16,128], index: 4, kind: output, shape index: {}]  }
   0x1   :  { %1976 = sst [smem:[#allocation27_spill]] %s1950_s1 }
   0x2   :  { %1977 = sst [smem:[#allocation28_spill]] %s1953_s4 }
   0x3   :  { %9 = vsyncpa [#allocation4], 0 }
   0x4   :  { %11 = vsyncpa [#allocation4 + $0x1], 0 }
   0x5   :  { %12 = vsyncpa [#allocation7], 0 }
   0x6   :  { %14 = vsyncpa [#allocation7 + $0x1], 0 }
   0x7   :  { %15 = vsyncpa [#allocation10], 0 }
   0x8   :  { %17 = vsyncpa [#allocation10 + $0x1], 0 }
   0x9   :  { %18 = vsyncpa [#allocation5], 0 }
   0xa   :  { %20 = vsyncpa [#allocation5 + $0x1], 0  ;;  %s1461_s15 = smov 0   ;;  %s1463_s16 = smov 0  }
   0xb   :  { %s1465_s17 = smov 0   ;;  %s1467_s18 = smov 0  }
   0xc   :  { %s1469_s19 = smov 0   ;;  %s1471_s20 = smov 0  }
   0xd   :  { %s1473_s21 = smov 0   ;;  %s1475_s22 = smov 0  }
   0xe   :  { %s1477_s23 = smov 0   ;;  %s1479_s24 = smov 0  }
   0xf   :  { %s1481_s25 = smov 0  }
  0x10 LB: > { %1978 = sst [smem:[#allocation16_spill]] %s1403_s20  ;;  %s35_s26 = sadd.s32 1, %s1415_s23  ;;  %s1423_s25 = sphi %s1481_s25, %s26_s25   ;;  %s1419_s24 = sphi %s1479_s24, %s2026_s24   ;;  %s1415_s23 = sphi %s1477_s23, %s2025_s23   ;;  %s1411_s22 = sphi %s1475_s22, %s2032_s22   ;;  %s1407_s21 = sphi %s1473_s21, %s2023_s21   ;;  %s1403_s20 = sphi %s1471_s20, %s2022_s20   ;;  %s1399_s19 = sphi %s1469_s19, %s2031_s19   ;;  %s1395_s18 = sphi %s1467_s18, %s2030_s18   ;;  %s1391_s17 = sphi %s1465_s17, %s2029_s17   ;;  %s1387_s16 = sphi %s1463_s16, %s2028_s16   ;;  %s1383_s15 = sphi %s1461_s15, %s2027_s15  }
  0x11   : > { %1979 = sst [smem:[#allocation17_spill]] %s1407_s21  ;;  %p1958_p0 = scmp.eq.s32.totalorder %s1423_s25, 0 }
  0x12   : > { %1980 = sst [smem:[#allocation18_spill]] %s1411_s22  ;;  %p1518_p1 = scmp.ge.s32.totalorder %s35_s26, 2 }
  0x13   : > { %1981 = sst [smem:[#allocation19_spill]] %s1415_s23  ;;  %s71_s28 = sadd.s32 1, %s1391_s17 }
  0x14   : > { %1982 = sst [smem:[#allocation20_spill]] %s1419_s24  ;;  %p78_p2 = scmp.ne.s32.totalorder %s1391_s17, %s1387_s16 }
  0x15   : > { %s1983_s27 = scalar_select %p1518_p1, 1, 0 }
  0x16   : > { %s2034_s26 = smov (%p1518_p1, %s35_s26), 0  ;;  %p80_p3 = por %p78_p2, %p1958_p0 }
  0x17   : > { %1984 = sst [smem:[#allocation21_spill]] %s2034_s26  ;;  %p1957_p4 = scmp.lt.s32.totalorder %s1423_s25, 4 }
  0x18   : > { %s68_s29 = ssub.s32 %s1415_s23, %s2034_s26  ;;  %s204_s30 = sand.u32 1, %s1423_s25  }
  0x19   : > { %p69_p5 = scmp.eq.s32.totalorder %s68_s29, 0  ;;  %s1954_s5 = sand.u32 1, %s1391_s17  }
  0x1a   : > { %s1537_s6 = sshll.u32 %s1415_s23, 11  ;;  %s1544_s8 = sshll.u32 %s1954_s5, 7 }
  0x1b   : > { %s1540_s7 = scalar_select %p69_p5, %s1391_s17, %s71_s28  }
  0x1c   : > { %s1986_s1 = sld [smem:[#allocation27_spill]]  ;;  %p1554_p6 = pnand %p1957_p4, %p80_p3 }
  0x1d   : > { %1985 = sst [smem:[#allocation22_spill]] %s1540_s7  ;;  %s208_s13 = scalar_lea.vmem [#allocation6], %s1544_s8 }
  0x1e   : > { %s1987_s12 = scalar_select %p1554_p6, 1, 0 }
  0x1f   : > { %s215_s14 = sshll.u32 %s208_s13, 4  ;;  %s1562_s28 = scalar_lea.sflag [#allocation7], %s204_s30  ;;  %s1559_s14 = int_to_ptr.vmem [resolvable:$true] %s215_s14 }
  0x20   : > { %p1568_p9 = pneg %p1554_p6 }
  0x22   : > { %s1550_s11 = scalar_lea.hbm %s1986_s1, %s1537_s6  ;;  %s1178_s13 = scalar_lea.hbm %s1986_s1, 4096 }
  0x23   : > { %s1173_s29 = scalar_lea.hbm %s1550_s11, 2048  ;;  %p1179_p12 = scmp.lt.u32.totalorder %s1550_s11, %s1986_s1 }
  0x24   : > { %p1174_p8 = scmp.ne.s32.totalorder %s1550_s11, %s1173_s29  ;;  %p1180_p13 = scmp.lt.u32.totalorder %s1178_s13, %s1173_s29 }
  0x25   : > { %p1182_p3 = scmp.lt.u32.totalorder %s1173_s29, %s1550_s11 }
  0x26   : > { %p1176_p10 = pnand %p1568_p9, %p1174_p8  ;;  %p1181_p2 = por %p1180_p13, %p1179_p12 }
  0x28   : > { %p1177_p11 = pneg %p1176_p10  ;;  %p1183_p5 = por %p1182_p3, %p1181_p2 }
  0x2a   : > { %p1184_p4 = pnand %p1183_p5, %p1177_p11 }
  0x2c   : > { %1187 = shalt.err (!%p1184_p4)
}
  0x2d   : > { %s1188_s30 = scalar_lea.vmem %s1559_s14, 2048  ;;  %s1425_s5 = smov [#allocation6]  }
  0x2e   : > { %p1189_p8 = scmp.ne.s32.totalorder %s1559_s14, %s1188_s30  ;;  %s1193_s10 = sshll.u32 %s1425_s5, 4  ;;  %s1194_s10 = int_to_ptr.vmem [resolvable:$false] %s1193_s10 }
  0x2f   : > { %s1195_s23 = scalar_lea.vmem %s1194_s10, 4096  ;;  %p1196_p7 = scmp.lt.s32.totalorder %s1559_s14, %s1194_s10 }
  0x30   : > { %p1191_p10 = pnand %p1189_p8, %p1568_p9  ;;  %p1197_p1 = scmp.lt.s32.totalorder %s1195_s23, %s1188_s30 }
  0x32   : > { %p1192_p0 = pneg %p1191_p10  ;;  %p1198_p12 = por %p1197_p1, %p1196_p7 }
  0x34   : > { %p1199_p13 = pnand %p1198_p12, %p1192_p0 }
  0x36   : > { %1202 = shalt.err (!%p1199_p13)
}
  0x37   : > { %s1960_s26 = smov 128   ;;  %s1962_s29 = smov 8  }
  0x38   : > { %1062 = dma.hbm_to_vmem [thread:$0]  (!%p1554_p6), %s1550_s11, 2048, %s1559_s14, %s1562_s28, %s1960_s26, %s1960_s26, %s1962_s29  }
  0x39   : > { %p265_p0 = scmp.lt.s32.totalorder %s1423_s25, 5  ;;  %p1989_p1 = scmp.ge.s32.totalorder %s1423_s25, 1 }
  0x3a   : > { %s1603_s30 = sadd.s32 4294967295, %s1423_s25   ;;  %s788_s5 = sadd.s32 4294967294, %s1423_s25  }
  0x3b   : > { %p1598_p4 = pnand %p1989_p1, %p265_p0  ;;  %s38_s10 = sadd.s32 1, %s1419_s24 }
  0x3c   : > { %s45_s23 = sadd.s32 1, %s1403_s20  ;;  %p1991_p7 = scmp.ne.s32.totalorder %s1983_s27, 0 }
  0x3d   : > { %s1990_s13 = scalar_select %p1598_p4, 1, 0 }
  0x3e   : > { %s2036_s10 = smov (!%p1991_p7, %s38_s10), %s1419_s24  ;;  %p52_p11 = scmp.ne.s32.totalorder %s1403_s20, %s1399_s19 }
  0x3f   : > { %p58_p2 = scmp.ne.s32.totalorder %s1399_s19, %s1395_s18  ;;  %p40_p3 = scmp.ge.s32.totalorder %s2036_s10, 2 }
  0x40   : > { %p59_p5 = scmp.eq.s32.totalorder %s1603_s30, 0  ;;  %p1992_p8 = scmp.eq.s32.totalorder %s1423_s25, 0 }
  0x41   : > { %p84_p12 = scmp.ne.s32.totalorder %s1387_s16, %s1383_s15  ;;  %s2038_s10 = smov (%p40_p3, %s2036_s10), 0 }
  0x42   : > { %p1621_p10 = por %p1992_p8, %p52_p11  ;;  %1994 = sst [smem:[#allocation23_spill]] %s2038_s10 }
  0x43   : > { %p1632_p13 = por %p59_p5, %p58_p2  ;;  %p1636_p0 = por %p84_p12, %p59_p5 }
  0x44   : > { %s42_s26 = ssub.s32 %s1419_s24, %s2038_s10  ;;  %p160_p1 = scmp.eq.s32.totalorder %s1603_s30, 3 }
  0x45   : > { %s1995_s27 = scalar_select %p1632_p13, 1, 0 }
  0x46   : > { %s1996_s14 = scalar_select %p1636_p0, 1, 0 }
  0x47   : > { %p43_p7 = scmp.eq.s32.totalorder %s42_s26, 0  ;;  %p166_p8 = scmp.eq.s32.totalorder %s788_s5, 3 }
  0x48   : > { %p1646_p3 = por %p160_p1, %p52_p11  ;;  %s186_s29 = sand.u32 1, %s1403_s20  }
  0x49   : > { %s1652_s1 = scalar_select %p43_p7, %s1403_s20, %s45_s23  }
  0x4a   : > { %s1997_s15 = scalar_select %p1646_p3, 1, 0 }
  0x4b   : > { %1999 = sst [smem:[#allocation25_spill]] %s1652_s1  ;;  %p1657_p4 = por %p166_p8, %p58_p2 }
  0x4c   : > { %1998 = sst [smem:[#allocation24_spill]] %s1997_s15  ;;  %s791_s4 = sshll.u32 %s186_s29, 3 }
  0x4d   : > { %s2000_s7 = scalar_select %p1657_p4, 1, 0 }
  0x4e   : > { %s792_s22 = sshll.u32 %s1419_s24, 7  ;;  %s190_s5 = scalar_lea.vmem [#allocation3], %s791_s4 }
  0x4f   : > { %2001 = sst [smem:[#allocation26_spill]] %s2000_s7  ;;  %s1665_s26 = scalar_lea.hbm %s1949_s0, %s792_s22 }
  0x50   : > { %s197_s15 = sshll.u32 %s190_s5, 4  ;;  %p2002_p11 = scmp.lt.s32.totalorder %s1423_s25, 4  ;;  %s1675_s15 = int_to_ptr.vmem [resolvable:$true] %s197_s15 }
  0x51   : > { %s1681_s22 = scalar_lea.hbm %s1951_s2, %s1537_s6  ;;  %s187_s10 = scalar_lea.sflag [#allocation4], %s186_s29 }
  0x52   : > { %p1671_p5 = pnand %p2002_p11, %p1621_p10  ;;  %s1203_s1 = scalar_lea.hbm %s1665_s26, 128 }
  0x53   : > { %p1204_p2 = scmp.ne.s32.totalorder %s1665_s26, %s1203_s1  ;;  %s1208_s5 = scalar_lea.hbm %s1949_s0, 256 }
  0x54   : > { %p1205_p12 = pneg %p1671_p5  ;;  %p1209_p7 = scmp.lt.u32.totalorder %s1665_s26, %s1949_s0 }
  0x55   : > { %p1210_p8 = scmp.lt.u32.totalorder %s1208_s5, %s1203_s1  ;;  %p1212_p4 = scmp.lt.u32.totalorder %s1203_s1, %s1665_s26 }
  0x56   : > { %p1206_p10 = pnand %p1205_p12, %p1204_p2 }
  0x57   : > { %p1211_p11 = por %p1210_p8, %p1209_p7 }
  0x58   : > { %p1207_p1 = pneg %p1206_p10 }
  0x59   : > { %p1213_p3 = por %p1212_p4, %p1211_p11 }
  0x5b   : > { %p1214_p0 = pnand %p1213_p3, %p1207_p1 }
  0x5d   : > { %1217 = shalt.err (!%p1214_p0)
}
  0x5e   : > { %s1218_s24 = scalar_lea.vmem %s1675_s15, 128  ;;  %s1428_s29 = smov [#allocation3]  }
  0x5f   : > { %p1219_p2 = scmp.ne.s32.totalorder %s1675_s15, %s1218_s24  ;;  %s1223_s21 = sshll.u32 %s1428_s29, 4  ;;  %s1224_s21 = int_to_ptr.vmem [resolvable:$false] %s1223_s21 }
  0x60   : > { %s1225_s20 = scalar_lea.vmem %s1224_s21, 256  ;;  %p1226_p6 = scmp.lt.s32.totalorder %s1675_s15, %s1224_s21 }
  0x61   : > { %p1221_p10 = pnand %p1219_p2, %p1205_p12  ;;  %p1227_p7 = scmp.lt.s32.totalorder %s1225_s20, %s1218_s24 }
  0x63   : > { %p1222_p13 = pneg %p1221_p10  ;;  %p1228_p8 = por %p1227_p7, %p1226_p6 }
  0x65   : > { %p1229_p4 = pnand %p1228_p8, %p1222_p13 }
  0x67   : > { %1232 = shalt.err (!%p1229_p4)
}
  0x68   : > { %1059 = dma.hbm_to_vmem [thread:$0]  (!%p1671_p5), %s1665_s26, 128, %s1675_s15, %s187_s10  }
  0x69   : > { %s229_s1 = scalar_lea.vmem [#allocation8], %s1544_s8  ;;  %s1233_s4 = scalar_lea.hbm %s1681_s22, 2048 }
  0x6a   : > { %s236_s7 = sshll.u32 %s229_s1, 4  ;;  %p1234_p0 = scmp.ne.s32.totalorder %s1681_s22, %s1233_s4  ;;  %s1709_s7 = int_to_ptr.vmem [resolvable:$true] %s236_s7 }
  0x6b   : > { %s1238_s5 = scalar_lea.hbm %s1951_s2, 4096  ;;  %p1239_p3 = scmp.lt.u32.totalorder %s1681_s22, %s1951_s2 }
  0x6c   : > { %p1236_p6 = pnand %p1234_p0, %p1568_p9  ;;  %p1240_p12 = scmp.lt.u32.totalorder %s1238_s5, %s1233_s4 }
  0x6d   : > { %p1242_p5 = scmp.lt.u32.totalorder %s1233_s4, %s1681_s22 }
  0x6e   : > { %p1237_p13 = pneg %p1236_p6  ;;  %p1241_p1 = por %p1240_p12, %p1239_p3 }
  0x70   : > { %p1243_p11 = por %p1242_p5, %p1241_p1 }
  0x72   : > { %p1244_p2 = pnand %p1243_p11, %p1237_p13 }
  0x74   : > { %1247 = shalt.err (!%p1244_p2)
}
  0x75   : > { %s1248_s15 = scalar_lea.vmem %s1709_s7, 2048  ;;  %s1429_s26 = smov [#allocation8]  }
  0x76   : > { %p1249_p10 = scmp.ne.s32.totalorder %s1709_s7, %s1248_s15  ;;  %s1253_s10 = sshll.u32 %s1429_s26, 4  ;;  %s1254_s10 = int_to_ptr.vmem [resolvable:$false] %s1253_s10 }
  0x77   : > { %s1255_s21 = scalar_lea.vmem %s1254_s10, 4096  ;;  %p1256_p4 = scmp.lt.s32.totalorder %s1709_s7, %s1254_s10 }
  0x78   : > { %p1251_p7 = pnand %p1249_p10, %p1568_p9  ;;  %p1257_p0 = scmp.lt.s32.totalorder %s1255_s21, %s1248_s15 }
  0x7a   : > { %p1252_p8 = pneg %p1251_p7  ;;  %p1258_p6 = por %p1257_p0, %p1256_p4 }
  0x7c   : > { %p1259_p3 = pnand %p1258_p6, %p1252_p8 }
  0x7e   : > { %1262 = shalt.err (!%p1259_p3)
}
  0x7f   : > { %p2004_p13 = scmp.ne.s32.totalorder %s1987_s12, 0  ;;  %s2005_s20 = smov 8  }
  0x80   : > { %s2006_s1 = smov 128   ;;  %s1740_s23 = scalar_lea.hbm %s1952_s3, %s1537_s6 }
  0x81   : > { %1065 = dma.hbm_to_vmem [thread:$0]  (!%p2004_p13), %s1681_s22, 2048, %s1709_s7, %s1562_s28, %s2006_s1, %s2006_s1, %s2005_s20  }
  0x82   : > { %s250_s5 = scalar_lea.vmem [#allocation9], %s1544_s8  ;;  %s2007_s29 = sand.u32 1, %s1391_s17  }
  0x83   : > { %s257_s24 = sshll.u32 %s250_s5, 4  ;;  %s1747_s15 = scalar_lea.sflag [#allocation10], %s2007_s29  ;;  %s1743_s24 = int_to_ptr.vmem [resolvable:$true] %s257_s24 }
  0x84   : > { %s1263_s26 = scalar_lea.hbm %s1740_s23, 2048  ;;  %s1268_s6 = scalar_lea.hbm %s1952_s3, 4096 }
  0x85   : > { %p1264_p12 = scmp.ne.s32.totalorder %s1740_s23, %s1263_s26  ;;  %p1269_p11 = scmp.lt.u32.totalorder %s1740_s23, %s1952_s3 }
  0x86   : > { %p1270_p2 = scmp.lt.u32.totalorder %s1268_s6, %s1263_s26  ;;  %p1272_p7 = scmp.lt.u32.totalorder %s1263_s26, %s1740_s23 }
  0x87   : > { %p1266_p1 = pnand %p1264_p12, %p1568_p9 }
  0x88   : > { %p1271_p10 = por %p1270_p2, %p1269_p11 }
  0x89   : > { %p1267_p5 = pneg %p1266_p1 }
  0x8a   : > { %p1273_p8 = por %p1272_p7, %p1271_p10 }
  0x8c   : > { %p1274_p4 = pnand %p1273_p8, %p1267_p5 }
  0x8e   : > { %1277 = shalt.err (!%p1274_p4)
}
  0x8f   : > { %s1278_s8 = scalar_lea.vmem %s1743_s24, 2048  ;;  %s1430_s21 = smov [#allocation9]  }
  0x90   : > { %p1279_p0 = scmp.ne.s32.totalorder %s1743_s24, %s1278_s8  ;;  %s1283_s4 = sshll.u32 %s1430_s21, 4  ;;  %s1284_s4 = int_to_ptr.vmem [resolvable:$false] %s1283_s4 }
  0x91   : > { %s1285_s11 = scalar_lea.vmem %s1284_s4, 4096  ;;  %p1286_p12 = scmp.lt.s32.totalorder %s1743_s24, %s1284_s4 }
  0x92   : > { %p1281_p6 = pnand %p1279_p0, %p1568_p9  ;;  %p1287_p1 = scmp.lt.s32.totalorder %s1285_s11, %s1278_s8 }
  0x94   : > { %p1282_p3 = pneg %p1281_p6  ;;  %p1288_p11 = por %p1287_p1, %p1286_p12 }
  0x96   : > { %p1289_p2 = pnand %p1288_p11, %p1282_p3 }
  0x98   : > { %1292 = shalt.err (!%p1289_p2)
}
  0x99   : > { %1068 = dma.hbm_to_vmem [thread:$0]  (!%p2004_p13), %s1740_s23, 2048, %s1743_s24, %s1747_s15, %s2006_s1, %s2006_s1, %s2005_s20  }
  0x9a   : > { %p2008_p9 = scmp.ne.s32.totalorder %s1990_s13, 0 }
  0x9b   : > { %s1777_s9 = sand.u32 (!%p2008_p9), 1, %s1399_s19   ;;  %p2009_p5 = scmp.ne.s32.totalorder (!%p2008_p9), %s1995_s27, 0 }
  0x9c   : > { %269 = sbr.rel (%p2008_p9) target bundleno = 745 (0x2e9), region = 36  ;;  %s803_s5 = sshll.u32 (!%p2008_p9), %s1777_s9, 3 }
  0x9d   : > { %s272_s29 = scalar_lea.sflag (!%p2008_p9), [#allocation4], %s1777_s9  ;;  %s1781_s26 = scalar_lea.vmem (!%p2008_p9), [#allocation3], %s803_s5 }
  0xa3   : > { %1366 = dma.done.wait (%p2009_p5), %s272_s29, 128  }
  0xa4   : > { %1368 = vsyncadd (%p2009_p5), %s272_s29, 4294967168  ;;  %s280_s12 = sand.u32 1, %s1603_s30   ;;  %s282_s13 = sand.u32 1, %s1387_s16  }
  0xa5   : > { %s804_s20 = sshll.u32 %s282_s13, 7  ;;  %s281_s1 = scalar_lea.sflag [#allocation7], %s280_s12 }
  0xa6   : > { %s1789_s23 = scalar_lea.vmem [#allocation6], %s804_s20  ;;  %p2010_p13 = scmp.ne.s32.totalorder %s1996_s14, 0 }
  0xa8   : > { %1370 = dma.done.wait (%p2010_p13), %s281_s1, 4096  }
  0xa9   : > { %1372 = vsyncadd (%p2010_p13), %s281_s1, 4294963200  ;;  %s1795_s24 = scalar_lea.vmem [#allocation8], %s804_s20  ;;  %s299_s15 = scalar_lea.sflag [#allocation10], %s282_s13 }
  0xaa   : > { %s1797_s27 = scalar_lea.vmem [#allocation9], %s804_s20 }
  0xab   : > { %1374 = dma.done.wait (%p2010_p13), %s299_s15, 2048  }
  0xac   : > { %1376 = vsyncadd (%p2010_p13), %s299_s15, 4294965248  ;;  %s1803_s30 = scalar_lea.vmem [#allocation11], %s803_s5  ;;  %s2011_s28 = sld [smem:[#allocation17_spill]] }
  0xb2   : > { %p808_p10 = scmp.ne.s32.totalorder %s2011_s28, 0 }
  0xb3   : > { %v1431_v0 = vmov (!%p808_p10), 0.0  }
  0xb4   : > { %348 = sbr.rel (%p808_p10) target bundleno = 187 (0xbb), region = 56  ;;  %349 = vst [vmem:[#allocation2] sm:$0xff] (!%p808_p10), %v1431_v0 }
  0xbb PF: > { %v352_v1 = vld [vmem:[%s1789_s23] sm:$0xff]  ;;  %v353_v2 = vld [vmem:[%s1789_s23 + $0x8] sm:$0xff]  ;;  %v1432_v3 = vmov 0.0|0.0   ;;  %vm1433_vm0 = vmmov 0   ;;  %v1434_v6 = vmov 0.0   ;;  %v354_v8 = vld [vmem:[%s1789_s23 + $0x10] sm:$0xff] }
  0xbc   : > { %974 = vmatprep.subr.bf16.mxu0 %v1432_v3  ;;  %v975_v4 = vpack.c.bf16 %v353_v2, %v352_v1  ;;  %998 = vmatprep.subr.bf16.mxu1 %v1432_v3  ;;  %v368_v5 = vld [vmem:[%s1795_s24] sm:$0xff]  ;;  %v369_v7 = vld [vmem:[%s1795_s24 + $0x8] sm:$0xff]  ;;  %v355_v9 = vld [vmem:[%s1789_s23 + $0x18] sm:$0xff]  ;;  %s2012_s14 = sld [smem:[#allocation17_spill]] }
  0xbd   : > { %901 = vmatprep.mubr.msk.f32.mxu0 %vm1433_vm0, %v1434_v6  ;;  %936 = vmatprep.mubr.msk.f32.mxu1 %vm1433_vm0, %v1434_v6  ;;  %v999_v10 = vpack.c.bf16 %v369_v7, %v368_v5  ;;  %v978_v11 = vpack.c.bf16 %v355_v9, %v354_v8  ;;  %v370_v12 = vld [vmem:[%s1795_s24 + $0x10] sm:$0xff]  ;;  %v371_v13 = vld [vmem:[%s1795_s24 + $0x18] sm:$0xff]  ;;  %v356_v15 = vld [vmem:[%s1789_s23 + $0x20] sm:$0xff] }
  0xbe   : > { %976 = vmatpush3.bf16.xpose.msra.mxu0 %v975_v4  ;;  %v1002_v14 = vpack.c.bf16 %v371_v13, %v370_v12  ;;  %v357_v16 = vld [vmem:[%s1789_s23 + $0x28] sm:$0xff]  ;;  %v372_v18 = vld [vmem:[%s1795_s24 + $0x20] sm:$0xff]  ;;  %v358_v21 = vld [vmem:[%s1789_s23 + $0x30] sm:$0xff] }
  0xbf   : > { %977 = vmatprep.subr.bf16.mxu0 %v1432_v3  ;;  %1000 = vmatpush3.bf16.xpose.msra.mxu1 %v999_v10  ;;  %v981_v17 = vpack.c.bf16 %v357_v16, %v356_v15  ;;  %v373_v19 = vld [vmem:[%s1795_s24 + $0x28] sm:$0xff]  ;;  %v359_v22 = vld [vmem:[%s1789_s23 + $0x38] sm:$0xff]  ;;  %v374_v24 = vld [vmem:[%s1795_s24 + $0x30] sm:$0xff] }
  0xc0   : > { %1001 = vmatprep.subr.bf16.mxu1 %v1432_v3  ;;  %v1005_v20 = vpack.c.bf16 %v373_v19, %v372_v18  ;;  %v984_v23 = vpack.c.bf16 %v359_v22, %v358_v21  ;;  %v375_v25 = vld [vmem:[%s1795_s24 + $0x38] sm:$0xff]  ;;  %v360_v27 = vld [vmem:[%s1789_s23 + $0x40] sm:$0xff]  ;;  %v361_v28 = vld [vmem:[%s1789_s23 + $0x48] sm:$0xff] }
  0xc1   : > { %v1008_v26 = vpack.c.bf16 %v375_v25, %v374_v24  ;;  %v987_v29 = vpack.c.bf16 %v361_v28, %v360_v27  ;;  %v376_v30 = vld [vmem:[%s1795_s24 + $0x40] sm:$0xff]  ;;  %v377_v31 = vld [vmem:[%s1795_s24 + $0x48] sm:$0xff]  ;;  %v362_v33 = vld [vmem:[%s1789_s23 + $0x50] sm:$0xff] }
  0xc2   : > { %v1011_v32 = vpack.c.bf16 %v377_v31, %v376_v30  ;;  %v363_v34 = vld [vmem:[%s1789_s23 + $0x58] sm:$0xff]  ;;  %v378_v36 = vld [vmem:[%s1795_s24 + $0x50] sm:$0xff]  ;;  %v364_v39 = vld [vmem:[%s1789_s23 + $0x60] sm:$0xff]  ;;  %p810_p7 = scmp.ne.s32.totalorder %s2012_s14, 1 }
  0xc3   : > { %v990_v35 = vpack.c.bf16 %v363_v34, %v362_v33  ;;  %v379_v37 = vld [vmem:[%s1795_s24 + $0x58] sm:$0xff]  ;;  %v365_v40 = vld [vmem:[%s1789_s23 + $0x68] sm:$0xff]  ;;  %v380_v42 = vld [vmem:[%s1795_s24 + $0x60] sm:$0xff] }
  0xc4   : > { %v1014_v38 = vpack.c.bf16 %v379_v37, %v378_v36  ;;  %v993_v41 = vpack.c.bf16 %v365_v40, %v364_v39  ;;  %v381_v43 = vld [vmem:[%s1795_s24 + $0x68] sm:$0xff]  ;;  %v366_v45 = vld [vmem:[%s1789_s23 + $0x70] sm:$0xff]  ;;  %v367_v46 = vld [vmem:[%s1789_s23 + $0x78] sm:$0xff] }
  0xc5   : > { %v1017_v44 = vpack.c.bf16 %v381_v43, %v380_v42  ;;  %v996_v47 = vpack.c.bf16 %v367_v46, %v366_v45  ;;  %v382_v48 = vld [vmem:[%s1795_s24 + $0x70] sm:$0xff]  ;;  %v383_v49 = vld [vmem:[%s1795_s24 + $0x78] sm:$0xff]  ;;  %v384_v52 = vld [vmem:[%s1797_s27] sm:$0xff] }
  0xc6   : > { %979 = vmatpush3.bf16.xpose.msra.mxu0 %v978_v11  ;;  %v1020_v50 = vpack.c.bf16 %v383_v49, %v382_v48  ;;  %v351_v51 = vld [vmem:[%s1781_s26] sm:$0xff]  ;;  %v385_v53 = vld [vmem:[%s1797_s27 + $0x8] sm:$0xff]  ;;  %v388_v58 = vld [vmem:[%s1797_s27 + $0x20] sm:$0xff] }
  0xc7   : > { %980 = vmatprep.subr.bf16.mxu0 %v1432_v3  ;;  %1003 = vmatpush3.bf16.xpose.msra.mxu1 %v1002_v14  ;;  %v1023_v54 = vpack.c.bf16 %v385_v53, %v384_v52  ;;  %v386_v55 = vld [vmem:[%s1797_s27 + $0x10] sm:$0xff]  ;;  %v387_v56 = vld [vmem:[%s1797_s27 + $0x18] sm:$0xff]  ;;  %v389_v59 = vld [vmem:[%s1797_s27 + $0x28] sm:$0xff] }
  0xc8   : > { %1004 = vmatprep.subr.bf16.mxu1 %v1432_v3  ;;  %v1026_v57 = vpack.c.bf16 %v387_v56, %v386_v55  ;;  %v1029_v60 = vpack.c.bf16 %v389_v59, %v388_v58  ;;  %v390_v61 = vld [vmem:[%s1797_s27 + $0x30] sm:$0xff]  ;;  %v391_v62 = vld [vmem:[%s1797_s27 + $0x38] sm:$0xff]  ;;  %v392_v0 = vld [vmem:[%s1797_s27 + $0x40] sm:$0xff] }
  0xc9   : > { %v1032_v63 = vpack.c.bf16 %v391_v62, %v390_v61  ;;  %v393_v1 = vld [vmem:[%s1797_s27 + $0x48] sm:$0xff]  ;;  %v394_v4 = vld [vmem:[%s1797_s27 + $0x50] sm:$0xff]  ;;  %v395_v5 = vld [vmem:[%s1797_s27 + $0x58] sm:$0xff] }
  0xca   : > { %v1035_v2 = vpack.c.bf16 %v393_v1, %v392_v0  ;;  %v396_v7 = vld [vmem:[%s1797_s27 + $0x60] sm:$0xff]  ;;  %v397_v8 = vld [vmem:[%s1797_s27 + $0x68] sm:$0xff]  ;;  %v398_v10 = vld [vmem:[%s1797_s27 + $0x70] sm:$0xff] }
  0xcb   : > { %v1041_v9 = vpack.c.bf16 %v397_v8, %v396_v7  ;;  %v399_v11 = vld [vmem:[%s1797_s27 + $0x78] sm:$0xff] }
  0xcc   : > { %v1044_v12 = vpack.c.bf16 %v399_v11, %v398_v10 }
  0xce   : > { %982 = vmatpush3.bf16.xpose.msra.mxu0 %v981_v17 }
  0xcf   : > { %983 = vmatprep.subr.bf16.mxu0 %v1432_v3  ;;  %1006 = vmatpush3.bf16.xpose.msra.mxu1 %v1005_v20 }
  0xd0   : > { %1007 = vmatprep.subr.bf16.mxu1 %v1432_v3 }
  0xd6   : > { %985 = vmatpush3.bf16.xpose.msra.mxu0 %v984_v23  ;;  %v350_v23 = vld [vmem:[#allocation2] sm:$0xff] }
  0xd7   : > { %986 = vmatprep.subr.bf16.mxu0 %v1432_v3  ;;  %1009 = vmatpush3.bf16.xpose.msra.mxu1 %v1008_v26 }
  0xd8   : > { %1010 = vmatprep.subr.bf16.mxu1 %v1432_v3 }
  0xde   : > { %988 = vmatpush3.bf16.xpose.msra.mxu0 %v987_v29 }
  0xdf   : > { %989 = vmatprep.subr.bf16.mxu0 %v1432_v3  ;;  %1012 = vmatpush3.bf16.xpose.msra.mxu1 %v1011_v32 }
  0xe0   : > { %1013 = vmatprep.subr.bf16.mxu1 %v1432_v3 }
  0xe6   : > { %991 = vmatpush3.bf16.xpose.msra.mxu0 %v990_v35 }
  0xe7   : > { %992 = vmatprep.subr.bf16.mxu0 %v1432_v3  ;;  %1015 = vmatpush3.bf16.xpose.msra.mxu1 %v1014_v38 }
  0xe8   : > { %1016 = vmatprep.subr.bf16.mxu1 %v1432_v3 }
  0xee   : > { %994 = vmatpush3.bf16.xpose.msra.mxu0 %v993_v41 }
  0xef   : > { %995 = vmatprep.subr.bf16.mxu0 %v1432_v3  ;;  %1018 = vmatpush3.bf16.xpose.msra.mxu1 %v1017_v44 }
  0xf0   : > { %1019 = vmatprep.subr.bf16.mxu1 %v1432_v3 }
  0xf6   : > { %997 = vmatpush3.bf16.xpose.msra.mxu0 %v996_v47 }
  0xf7   : > { %1022 = vmatprep.subr.bf16.mxu0 %v1432_v3  ;;  %1021 = vmatpush3.bf16.xpose.msra.mxu1 %v1020_v50 }
  0xfd   : > { %902 = vmatmul.mubr.f32.vlgmr.msra.gmra.mrb[0].mxu0 %v351_v51 }
  0xfe   : > { %971 = vmatprep.mubr.msk.f32.mxu0 %vm1433_vm0, %v1434_v6  ;;  %937 = vmatmul.mubr.f32.vlgmr.msra.gmra.mrb[0].mxu1 %v351_v51  ;;  %v1038_v6 = vpack.c.bf16 %v395_v5, %v394_v4 }
  0xff   : > { %1024 = vmatpush3.bf16.msra.mxu0 %v1023_v54 }
 0x100   : > { %1025 = vmatprep.subr.bf16.mxu0 %v1432_v3 }
 0x103   : > { %1027 = vmatpush3.bf16.msra.mxu0 %v1026_v57 }
 0x104   : > { %1028 = vmatprep.subr.bf16.mxu0 %v1432_v3 }
 0x107   : > { %1030 = vmatpush3.bf16.msra.mxu0 %v1029_v60 }
 0x108   : > { %1031 = vmatprep.subr.bf16.mxu0 %v1432_v3 }
 0x10b   : > { %1033 = vmatpush3.bf16.msra.mxu0 %v1032_v63 }
 0x10c   : > { %1034 = vmatprep.subr.bf16.mxu0 %v1432_v3 }
 0x10f   : > { %1036 = vmatpush3.bf16.msra.mxu0 %v1035_v2 }
 0x110   : > { %1037 = vmatprep.subr.bf16.mxu0 %v1432_v3 }
 0x113   : > { %1039 = vmatpush3.bf16.msra.mxu0 %v1038_v6 }
 0x114   : > { %1040 = vmatprep.subr.bf16.mxu0 %v1432_v3 }
 0x117   : > { %1042 = vmatpush3.bf16.msra.mxu0 %v1041_v9 }
 0x118   : > { %1043 = vmatprep.subr.bf16.mxu0 %v1432_v3 }
 0x11b   : > { %1045 = vmatpush3.bf16.msra.mxu0 %v1044_v12 }
 0x1d0   : > { %v466_v13 = vpop.f32.mrb[0].mxu0 }
 0x1d1   : > { %v809_v14 = vmul.f32 -1.442695, %v466_v13  ;;  %v903_v15 = vpop.f32.mrb[1].mxu0  ;;  %v536_v16 = vpop.f32.mrb[0].mxu1 }
 0x1d2   : > { %v938_v17 = vpop.f32.mrb[1].mxu1 }
 0x1d3   : > { %1169 = vpow2.f32 %v809_v14 }
 0x1dd   : > { %v1170_v18 = vpop.eup %1169 }
 0x1de   : > { %v543_v19 = vadd.f32 1.0, %v1170_v18 }
 0x1e0   : > { %1171 = vrcp.f32 %v543_v19 }
 0x1ea   : > { %v1172_v20 = vpop.eup %1171 }
 0x1eb   : > { %v546_v21 = vmul.f32 %v1172_v20, %v466_v13 }
 0x1ed   : > { %v547_v22 = vmul.f32 %v546_v21, %v536_v16 }
 0x1ef   : > { %972 = vmatmul.mubr.f32.vlgmr.msra.gmra.mrb[2].mxu0 %v547_v22 }
 0x2bf   : > { %623 = sbr.rel (%p810_p7) target bundleno = 718 (0x2ce), region = 60 }
 0x2c2   : > { %v614_v24 = vpop.f32.mrb[2].mxu0 }
 0x2c3   : > { %v618_v3 = vadd.f32 %v614_v24, %v350_v23  ;;  %v973_v25 = vpop.f32.mrb[3].mxu0 }
 0x2c5   : > { %619 = vst [vmem:[#allocation2] sm:$0xff] %v618_v3 }
 0x2cc   : > { %v624_v26 = vld [vmem:[#allocation2] sm:$0xff] }
 0x2cd   : > { %625 = vst [vmem:[%s1803_s30] sm:$0xff] %v624_v26 }
 0x2ce PF: > { %s2013_s22 = sld [smem:[#allocation18_spill]]  ;;  %s2014_s6 = sld [smem:[#allocation24_spill]] }
 0x2cf   : > { %s2015_s21 = sld [smem:[#allocation28_spill]]  ;;  %s640_s5 = sshll.u32 %s1803_s30, 4  ;;  %s641_s5 = int_to_ptr.vmem [resolvable:$true] %s640_s5 }
 0x2d0   : > { %s627_s29 = scalar_lea.sflag [#allocation5], %s1777_s9  ;;  %s1293_s26 = scalar_lea.vmem %s641_s5, 128 }
 0x2d1   : > { %p1294_p8 = scmp.ne.s32.totalorder %s641_s5, %s1293_s26  ;;  %s1435_s12 = smov [#allocation11]  }
 0x2d2   : > { %s1297_s13 = sshll.u32 %s1435_s12, 4  ;;  %s1298_s13 = int_to_ptr.vmem [resolvable:$false] %s1297_s13 }
 0x2d3   : > { %s1299_s20 = scalar_lea.vmem %s1298_s13, 256  ;;  %p1300_p3 = scmp.lt.s32.totalorder %s641_s5, %s1298_s13 }
 0x2d4   : > { %s812_s7 = sshll.u32 %s2013_s22, 7  ;;  %p2017_p4 = scmp.ne.s32.totalorder %s2014_s6, 0 }
 0x2d5   : > { %s2016_s4 = smov %s2015_s21  ;;  %s1891_s11 = scalar_lea.hbm %s2015_s21, %s812_s7 }
 0x2d6   : > { %p1295_p0 = pnand %p1294_p8, %p2017_p4  ;;  %p1301_p12 = scmp.lt.s32.totalorder %s1299_s20, %s1293_s26 }
 0x2d8   : > { %p1296_p6 = pneg %p1295_p0  ;;  %p1302_p1 = por %p1301_p12, %p1300_p3 }
 0x2da   : > { %p1303_p11 = pnand %p1302_p1, %p1296_p6 }
 0x2dc   : > { %1306 = shalt.err (!%p1303_p11)
}
 0x2dd   : > { %s1307_s9 = scalar_lea.hbm %s1891_s11, 128  ;;  %s1311_s24 = scalar_lea.hbm %s2016_s4, 256 }
 0x2de   : > { %p1308_p2 = scmp.ne.s32.totalorder %s1891_s11, %s1307_s9  ;;  %p1312_p13 = scmp.lt.u32.totalorder %s1891_s11, %s2016_s4 }
 0x2df   : > { %p1313_p10 = scmp.lt.u32.totalorder %s1311_s24, %s1307_s9  ;;  %p1315_p8 = scmp.lt.u32.totalorder %s1307_s9, %s1891_s11 }
 0x2e0   : > { %p1309_p9 = pnand %p1308_p2, %p2017_p4 }
 0x2e1   : > { %p1314_p7 = por %p1313_p10, %p1312_p13 }
 0x2e2   : > { %p1310_p5 = pneg %p1309_p9 }
 0x2e3   : > { %p1316_p0 = por %p1315_p8, %p1314_p7 }
 0x2e5   : > { %p1317_p6 = pnand %p1316_p0, %p1310_p5 }
 0x2e7   : > { %1320 = shalt.err (!%p1317_p6)
}
 0x2e8   : > { %1054 = dma.vmem_to_hbm [thread:$0]  (%p2017_p4), %s641_s5, 128, %s1891_s11, %s627_s29  }
 0x2e9 PF: > { %s2018_s30 = sld [smem:[#allocation26_spill]]  ;;  %p1074_p3 = scmp.ge.s32.totalorder %s1423_s25, 2 }
 0x2ea   : > { %s652_s28 = sand.u32 1, %s1395_s18  }
 0x2eb   : > { %s653_s14 = scalar_lea.sflag [#allocation5], %s652_s28 }
 0x2ef   : > { %p2019_p12 = scmp.ne.s32.totalorder %s2018_s30, 0 }
 0x2f1   : > { %p1070_p1 = pnand %p1074_p3, %p2019_p12 }
 0x2f3   : > { %1378 = dma.done.wait (!%p1070_p1), %s653_s14, 128  }
 0x2f4   : > { %1380 = vsyncadd (!%p1070_p1), %s653_s14, 4294967168  ;;  %s26_s25 = sadd.s32 1, %s1423_s25   ;;  %s2020_s22 = sld [smem:[#allocation22_spill]] }
 0x2f5   : > { %p23_p11 = scmp.ge.s32.totalorder %s26_s25, 6   ;;  %s2021_s6 = sld [smem:[#allocation16_spill]] }
 0x2f6   : > { %s2022_s20 = sld [smem:[#allocation25_spill]]  ;;  %s2023_s21 = sld [smem:[#allocation19_spill]] }
 0x2f7   : > { %s2024_s7 = sld [smem:[#allocation20_spill]]  ;;  %s2025_s23 = sld [smem:[#allocation21_spill]] }
 0x2f8   : > { %s2026_s24 = sld [smem:[#allocation23_spill]]  ;;  %s2027_s15 = smov %s1387_s16 }
 0x2f9   : > { %s2028_s16 = smov %s1391_s17  ;;  %s2030_s18 = smov %s1399_s19 }
 0x2fa   : > { %s2029_s17 = smov %s2020_s22  ;;  %25 = sbr.rel (!%p23_p11) target bundleno = 16 (0x10), region = 126 }
 0x2fb   : > { %s2031_s19 = smov %s2021_s6 }
 0x2fd   : > { %s2032_s22 = smov %s2024_s7 }
 0x301   :  { %658 = vsyncpa [#allocation4], 1 }
 0x302   :  { %660 = vsyncpa [#allocation4 + $0x1], 1 }
 0x303   :  { %661 = vsyncpa [#allocation7], 1 }
 0x304   :  { %663 = vsyncpa [#allocation7 + $0x1], 1 }
 0x305   :  { %664 = vsyncpa [#allocation10], 1 }
 0x306   :  { %666 = vsyncpa [#allocation10 + $0x1], 1 }
 0x307   :  { %667 = vsyncpa [#allocation5], 1 }
 0x308   :  { %669 = vsyncpa [#allocation5 + $0x1], 1 }

</bundles_post_ra>
